<compile_context>
chip_gen: v5e
topology: v5e:2x2
jax: 0.10.0
libtpu: 0.0.40
codegen_flags: <defaults>
</compile_context>

<pallas_src>
import functools

import jax
import jax.numpy as jnp
from jax import lax
from jax.experimental import pallas as pl
from jax.experimental.pallas import tpu as pltpu


def _critic_chunk_kernel(state_ref, h0_ref, c0_ref,
                         w_all_ref, b_fused_ref,
                         w_hid_ref, b_hid_ref,
                         w_out_ref, b_out_ref,
                         value_ref, h_out_ref, c_out_ref,
                         *, hidden_size, n_hidden_layers, t_chunk, t_total):
    H = hidden_size
    L = n_hidden_layers
    chunk = pl.program_id(0)

    # Recurrent carry lives in the constant-index output refs (VMEM resident
    # across the "arbitrary" chunk axis; written back to HBM once at the end).
    @pl.when(chunk == 0)
    def _():
        h_out_ref[...] = h0_ref[...]
        c_out_ref[...] = c0_ref[...]

    # Constants hoisted out of the time loop (traced once).
    lane = jax.lax.broadcasted_iota(jnp.int32, (1, 4 * H), 1)
    g_lanes = (lane >= 2 * H) & (lane < 3 * H)              # tanh (g) lanes
    gate_scale = jnp.where(g_lanes, 1.0, 0.5).astype(jnp.float32)
    w_all = w_all_ref[...]                                   # (S+H, 4H)
    b_fused = b_fused_ref[...]                               # (1, 4H)
    w_out_row = w_out_ref[...]                               # (1, H)
    b_out = b_out_ref[0]                                     # SMEM scalar
    needs_guard = (t_total % t_chunk) != 0

    def step(local_t, carry):
        h_prev, c_prev = carry
        s_t = state_ref[local_t]                             # (B, S)

        # Single fused MXU matmul:
        #   z = [state | h] @ [[W_in @ W_ih]; [W_hh]] + (b_in@W_ih + b_ih + b_hh)
        xh = jnp.concatenate([s_t, h_prev], axis=-1)         # (B, S+H)
        z = jnp.dot(xh, w_all,
                    preferred_element_type=jnp.float32) + b_fused  # (B, 4H)

        # One EUP pass over the whole (B, 4H) vreg:
        #   i/f/o lanes: sigmoid(z) = 0.5*tanh(z/2) + 0.5 ;  g lanes: tanh(z)
        t_act = jnp.tanh(z * gate_scale)
        act = jnp.where(g_lanes, t_act, 0.5 * t_act + 0.5)

        i_gate = act[:, 0:H]
        f_gate = act[:, H:2 * H]
        g_gate = act[:, 2 * H:3 * H]
        o_gate = act[:, 3 * H:4 * H]

        c_new = f_gate * c_prev + i_gate * g_gate
        h_new = o_gate * jnp.tanh(c_new)

        # Hidden layers: tanh(Linear(y))
        y = h_new
        for layer in range(L):
            y = jnp.tanh(jnp.dot(y, w_hid_ref[layer],
                                 preferred_element_type=jnp.float32)
                         + b_hid_ref[layer])

        # Output layer as a VPU lane reduction; row store into the lane-dense
        # (T_CHUNK, B_pad) value block (written back once per chunk).
        v = jnp.sum(y * w_out_row, axis=-1) + b_out          # (B,)
        value_ref[local_t, :] = v

        if needs_guard:
            # Padded tail timesteps must not advance the recurrent state.
            valid = (chunk * t_chunk + local_t) < t_total
            h_new = jnp.where(valid, h_new, h_prev)
            c_new = jnp.where(valid, c_new, c_prev)
        return h_new, c_new

    h_fin, c_fin = lax.fori_loop(0, t_chunk, step,
                                 (h_out_ref[...], c_out_ref[...]),
                                 unroll=True)
    h_out_ref[...] = h_fin
    c_out_ref[...] = c_fin


def _pad_axis_to(x, axis, size):
    if x.shape[axis] == size:
        return x
    pad = [(0, 0)] * x.ndim
    pad[axis] = (0, size - x.shape[axis])
    return jnp.pad(x, pad)


@jax.jit
def critic_forward_sequence(states, h0, c0, params):
    """Runs T Critic.forward steps (shared recurrent state) in ONE pallas_call.

    states: (T, B, S);  h0, c0: (B, H)
    Returns (values (T, B, 1), h_T (B, H), c_T (B, H)).
    """
    T, B, S = states.shape
    H = params["w_hh"].shape[0]
    L = params["w_hid"].shape[0]

    # Fill f32 sublanes: pad batch to a multiple of 8.
    B_pad = max(8, ((B + 7) // 8) * 8)

    # Time chunking: one grid step per chunk, fori_loop inside. 32-step chunks
    # keep VMEM tiny (well under v7x's 32 MiB scoped default) and keep the
    # unrolled loop compile-friendly.  T=8 -> single chunk, grid=(1,).
    T_CHUNK = min(T, 32)
    n_chunks = -(-T // T_CHUNK)
    T_pad = n_chunks * T_CHUNK

    states_p = _pad_axis_to(_pad_axis_to(states, 1, B_pad), 0, T_pad)
    h0_p = _pad_axis_to(h0, 0, B_pad)
    c0_p = _pad_axis_to(c0, 0, B_pad)

    # Fold the input Linear into the LSTM input-gate weights, then stack with
    # W_hh so the kernel does a single [state|h] @ W_all matmul per step.
    hp = jax.lax.Precision.HIGHEST
    w_fused = jnp.dot(params["w_in"], params["w_ih"], precision=hp)       # (S, 4H)
    b_fused = (jnp.dot(params["b_in"], params["w_ih"], precision=hp)
               + params["b_lstm"])                                        # (1, 4H)
    w_all = jnp.concatenate([w_fused, params["w_hh"]], axis=0)            # (S+H, 4H)
    b_out_smem = params["b_out"].reshape((1,))                            # SMEM scalar

    kernel = functools.partial(_critic_chunk_kernel,
                               hidden_size=H, n_hidden_layers=L,
                               t_chunk=T_CHUNK, t_total=T)

    out_shape = (
        jax.ShapeDtypeStruct((T_pad, B_pad), jnp.float32),   # values (lane-dense)
        jax.ShapeDtypeStruct((B_pad, H), jnp.float32),       # final h
        jax.ShapeDtypeStruct((B_pad, H), jnp.float32),       # final c
    )

    in_specs = [
        pl.BlockSpec((T_CHUNK, B_pad, S), lambda t: (t, 0, 0)),  # states chunk
        pl.BlockSpec((B_pad, H), lambda t: (0, 0)),              # h0 (fetched once)
        pl.BlockSpec((B_pad, H), lambda t: (0, 0)),              # c0 (fetched once)
        pl.BlockSpec((S + H, 4 * H), lambda t: (0, 0)),          # W_all (resident)
        pl.BlockSpec((1, 4 * H), lambda t: (0, 0)),              # b_fused
        pl.BlockSpec((L, H, H), lambda t: (0, 0, 0)),            # hidden weights
        pl.BlockSpec((L, 1, H), lambda t: (0, 0, 0)),            # hidden biases
        pl.BlockSpec((1, H), lambda t: (0, 0)),                  # w_out (row)
        pl.BlockSpec(memory_space=pltpu.MemorySpace.SMEM),       # b_out scalar
    ]
    out_specs = (
        pl.BlockSpec((T_CHUNK, B_pad), lambda t: (t, 0)),        # values per chunk
        pl.BlockSpec((B_pad, H), lambda t: (0, 0)),              # h carry / final
        pl.BlockSpec((B_pad, H), lambda t: (0, 0)),              # c carry / final
    )

    values_p, h_p, c_p = pl.pallas_call(
        kernel,
        out_shape=out_shape,
        grid=(n_chunks,),
        in_specs=in_specs,
        out_specs=out_specs,
        input_output_aliases={1: 1, 2: 2},   # h0 -> h_out, c0 -> c_out
        compiler_params=pltpu.CompilerParams(
            dimension_semantics=("arbitrary",)),   # sequential recurrence
    )(states_p, h0_p, c0_p, w_all, b_fused,
      params["w_hid"], params["b_hid"], params["w_out"], b_out_smem)

    values = values_p[:T, :B][..., None]          # (T, B, 1)
    return values, h_p[:B], c_p[:B]


def critic_forward(state, h0, c0, params):
    """Single Critic.forward step. Returns (value (B,1), h_new, c_new)."""
    values, h_new, c_new = critic_forward_sequence(state[None], h0, c0, params)
    return values[0], h_new, c_new


def init_params(key, state_space, hidden_size, n_hidden_layers):
    """Deterministic synthetic parameters (shapes mirror the PyTorch module)."""
    ks = jax.random.split(key, 10)
    H, S, L = hidden_size, state_space, n_hidden_layers
    scale = 0.1
    return {
        # input_layer: torch weight (H, S) -> stored transposed (S, H)
        "w_in": scale * jax.random.normal(ks[0], (S, H), jnp.float32),
        "b_in": scale * jax.random.normal(ks[1], (1, H), jnp.float32),
        # LSTMCell: torch weight_ih/_hh (4H, H) -> stored transposed (H, 4H)
        "w_ih": scale * jax.random.normal(ks[2], (H, 4 * H), jnp.float32),
        "w_hh": scale * jax.random.normal(ks[3], (H, 4 * H), jnp.float32),
        # bias_ih + bias_hh pre-summed (mathematically identical)
        "b_lstm": scale * jax.random.normal(ks[4], (1, 4 * H), jnp.float32),
        # hidden layers: torch weight (H, H) each -> stacked (L, H, H)
        "w_hid": scale * jax.random.normal(ks[5], (L, H, H), jnp.float32),
        "b_hid": scale * jax.random.normal(ks[6], (L, 1, H), jnp.float32),
        # output layer: torch weight (1, H) kept as a (1, H) row
        "w_out": scale * jax.random.normal(ks[7], (1, H), jnp.float32),
        "b_out": scale * jax.random.normal(ks[8], (1, 1), jnp.float32),
    }


def critic_forward_sequence_ref(states, h0, c0, p):
    """Pure-JAX reference (unfused, PyTorch-ordered math)."""
    H = p["w_hh"].shape[0]
    L = p["w_hid"].shape[0]
    h, c = h0, c0
    vals = []
    for t in range(states.shape[0]):
        x = states[t] @ p["w_in"] + p["b_in"]
        z = x @ p["w_ih"] + h @ p["w_hh"] + p["b_lstm"]
        i = jax.nn.sigmoid(z[:, 0:H])
        f = jax.nn.sigmoid(z[:, H:2 * H])
        g = jnp.tanh(z[:, 2 * H:3 * H])
        o = jax.nn.sigmoid(z[:, 3 * H:4 * H])
        c = f * c + i * g
        h = o * jnp.tanh(c)
        y = h
        for l in range(L):
            y = jnp.tanh(y @ p["w_hid"][l] + p["b_hid"][l])
        vals.append(y @ p["w_out"].T + p["b_out"])
    return jnp.stack(vals), h, c


def critic_forward_ref(state, h0, c0, p):
    vals, h, c = critic_forward_sequence_ref(state[None], h0, c0, p)
    return vals[0], h, c


if __name__ == "__main__":
    batch = 2
    state_space = 16
    hidden_size = 32
    n_hidden_layers = 2
    T = 8

    key = jax.random.PRNGKey(0)
    k_param, k_state, k_seq = jax.random.split(key, 3)
    params = init_params(k_param, state_space, hidden_size, n_hidden_layers)

    # --- single step: module.forward(state, hidden_state=None) -> zeros h/c ---
    state = jax.random.normal(k_state, (batch, state_space), jnp.float32)
    h0 = jnp.zeros((batch, hidden_size), jnp.float32)
    c0 = jnp.zeros((batch, hidden_size), jnp.float32)

    value, h1, c1 = critic_forward(state, h0, c0, params)
    jax.block_until_ready((value, h1, c1))

    v_ref, h_ref, c_ref = critic_forward_ref(state, h0, c0, params)
    # atol 1e-4: folding W_in into W_ih changes FP association slightly.
    assert value.shape == (batch, 1)
    assert jnp.allclose(value, v_ref, atol=1e-4)
    assert jnp.allclose(h1, h_ref, atol=1e-4)
    assert jnp.allclose(c1, c_ref, atol=1e-4)

    # --- T-step rollout: one grid chunk, in-kernel unrolled recurrence ---
    states = jax.random.normal(k_seq, (T, batch, state_space), jnp.float32)
    vals, hT, cT = critic_forward_sequence(states, h0, c0, params)
    jax.block_until_ready((vals, hT, cT))

    vals_ref, hT_ref, cT_ref = critic_forward_sequence_ref(states, h0, c0, params)
    assert vals.shape == (T, batch, 1)
    assert jnp.allclose(vals, vals_ref, atol=1e-4)
    assert jnp.allclose(hT, hT_ref, atol=1e-4)
    assert jnp.allclose(cT, cT_ref, atol=1e-4)

    print("KERNEL_OK")
</pallas_src>

<mosaic_0001>
module attributes {stable_mosaic.version = 11 : i64} {
  func.func @_critic_chunk_kernel(%arg0: i32, %arg1: memref<1x8x16xf32, #tpu.memory_space<vmem>>, %arg2: memref<8x32xf32, #tpu.memory_space<vmem>>, %arg3: memref<8x32xf32, #tpu.memory_space<vmem>>, %arg4: memref<48x128xf32, #tpu.memory_space<vmem>>, %arg5: memref<1x128xf32, #tpu.memory_space<vmem>>, %arg6: memref<2x32x32xf32, #tpu.memory_space<vmem>>, %arg7: memref<2x1x32xf32, #tpu.memory_space<vmem>>, %arg8: memref<1x32xf32, #tpu.memory_space<vmem>>, %arg9: memref<1xf32, #tpu.memory_space<smem>>, %arg10: memref<1x8xf32, #tpu.memory_space<vmem>>, %arg11: memref<8x32xf32, #tpu.memory_space<vmem>>, %arg12: memref<8x32xf32, #tpu.memory_space<vmem>>) attributes {dimension_semantics = [#tpu.dimension_semantics<arbitrary>], iteration_bounds = array<i64: 1>, scalar_prefetch = 0 : i64, scratch_operands = 0 : i64, tpu.core_type = #tpu.core_type<tc>, window_params = [{transform_indices = @transform_0, window_bounds = array<i64: 1, 8, 16>}, {pipeline_mode = #tpu.pipeline_mode<synchronous>, transform_indices = @transform_1, window_bounds = array<i64: 8, 32>}, {pipeline_mode = #tpu.pipeline_mode<synchronous>, transform_indices = @transform_2, window_bounds = array<i64: 8, 32>}, {pipeline_mode = #tpu.pipeline_mode<synchronous>, transform_indices = @transform_3, window_bounds = array<i64: 48, 128>}, {pipeline_mode = #tpu.pipeline_mode<synchronous>, transform_indices = @transform_4, window_bounds = array<i64: 1, 128>}, {pipeline_mode = #tpu.pipeline_mode<synchronous>, transform_indices = @transform_5, window_bounds = array<i64: 2, 32, 32>}, {pipeline_mode = #tpu.pipeline_mode<synchronous>, transform_indices = @transform_6, window_bounds = array<i64: 2, 1, 32>}, {pipeline_mode = #tpu.pipeline_mode<synchronous>, transform_indices = @transform_7, window_bounds = array<i64: 1, 32>}, {transform_indices = @transform_8, window_bounds = array<i64: 1>}, {transform_indices = @transform_9, window_bounds = array<i64: 1, 8>}, {pipeline_mode = #tpu.pipeline_mode<synchronous>, transform_indices = @transform_10, window_bounds = array<i64: 8, 32>}, {pipeline_mode = #tpu.pipeline_mode<synchronous>, transform_indices = @transform_11, window_bounds = array<i64: 8, 32>}]} {
    %c0_i32 = arith.constant 0 : i32
    %0 = arith.cmpi eq, %arg0, %c0_i32 : i32
    %1 = arith.extui %0 : i1 to i32
    %c0_i32_0 = arith.constant 0 : i32
    %2 = arith.cmpi ne, %1, %c0_i32_0 : i32
    scf.if %2 {
      %c0_37 = arith.constant 0 : index
      %c0_38 = arith.constant 0 : index
      %71 = vector.load %arg2[%c0_37, %c0_38] : memref<8x32xf32, #tpu.memory_space<vmem>>, vector<8x32xf32>
      %c0_39 = arith.constant 0 : index
      %c0_40 = arith.constant 0 : index
      %72 = vector.load %arg11[%c0_39, %c0_40] : memref<8x32xf32, #tpu.memory_space<vmem>>, vector<8x32xf32>
      tpu.vector_store %arg11[%c0_39, %c0_40], %71 {strides = array<i32>} : memref<8x32xf32, #tpu.memory_space<vmem>>, vector<8x32xf32>,
      %c0_41 = arith.constant 0 : index
      %c0_42 = arith.constant 0 : index
      %73 = vector.load %arg3[%c0_41, %c0_42] : memref<8x32xf32, #tpu.memory_space<vmem>>, vector<8x32xf32>
      %c0_43 = arith.constant 0 : index
      %c0_44 = arith.constant 0 : index
      %74 = vector.load %arg12[%c0_43, %c0_44] : memref<8x32xf32, #tpu.memory_space<vmem>>, vector<8x32xf32>
      tpu.vector_store %arg12[%c0_43, %c0_44], %73 {strides = array<i32>} : memref<8x32xf32, #tpu.memory_space<vmem>>, vector<8x32xf32>,
    } else {
    }
    %3 = tpu.iota {dimensions = array<i32: 1>} : vector<1x128xi32>
    %c64_i32 = arith.constant 64 : i32
    %4 = vector.broadcast %c64_i32 : i32 to vector<1x128xi32>
    %5 = arith.cmpi sge, %3, %4 : vector<1x128xi32>
    %c96_i32 = arith.constant 96 : i32
    %6 = vector.broadcast %c96_i32 : i32 to vector<1x128xi32>
    %7 = arith.cmpi slt, %3, %6 : vector<1x128xi32>
    %8 = arith.andi %5, %7 : vector<1x128xi1>
    %cst = arith.constant 1.000000e+00 : f32
    %cst_1 = arith.constant 5.000000e-01 : f32
    %9 = vector.broadcast %cst : f32 to vector<1x128xf32>
    %10 = vector.broadcast %cst_1 : f32 to vector<1x128xf32>
    %11 = arith.select %8, %9, %10 : vector<1x128xi1>, vector<1x128xf32>
    %c0 = arith.constant 0 : index
    %c0_2 = arith.constant 0 : index
    %12 = vector.load %arg4[%c0, %c0_2] : memref<48x128xf32, #tpu.memory_space<vmem>>, vector<48x128xf32>
    %c0_3 = arith.constant 0 : index
    %c0_4 = arith.constant 0 : index
    %13 = vector.load %arg5[%c0_3, %c0_4] : memref<1x128xf32, #tpu.memory_space<vmem>>, vector<1x128xf32>
    %c0_5 = arith.constant 0 : index
    %c0_6 = arith.constant 0 : index
    %14 = vector.load %arg8[%c0_5, %c0_6] : memref<1x32xf32, #tpu.memory_space<vmem>>, vector<1x32xf32>
    %c0_7 = arith.constant 0 : index
    %15 = memref.load %arg9[%c0_7] : memref<1xf32, #tpu.memory_space<smem>>
    %c0_8 = arith.constant 0 : index
    %c0_9 = arith.constant 0 : index
    %16 = vector.load %arg11[%c0_8, %c0_9] : memref<8x32xf32, #tpu.memory_space<vmem>>, vector<8x32xf32>
    %c0_10 = arith.constant 0 : index
    %c0_11 = arith.constant 0 : index
    %17 = vector.load %arg12[%c0_10, %c0_11] : memref<8x32xf32, #tpu.memory_space<vmem>>, vector<8x32xf32>
    %c0_i32_12 = arith.constant 0 : i32
    %18 = arith.index_cast %c0_i32_12 : i32 to index
    %c0_13 = arith.constant 0 : index
    %c0_14 = arith.constant 0 : index
    %19 = vector.load %arg1[%18, %c0_13, %c0_14] : memref<1x8x16xf32, #tpu.memory_space<vmem>>, vector<1x8x16xf32>
    %20 = vector.shape_cast %19 : vector<1x8x16xf32> to vector<8x16xf32>
    %21 = tpu.concatenate %20, %16 in 1 : vector<8x16xf32>, vector<8x32xf32> -> vector<8x48xf32>
    %cst_15 = arith.constant dense<0.000000e+00> : vector<8x128xf32>
    %22 = tpu.matmul %21, %12, %cst_15 {dimension_numbers = #tpu.dot_dimension_numbers<[1], [0], [0], [1], [0, 0, 1, 1], [], []>} : vector<8x48xf32>, vector<48x128xf32>, vector<8x128xf32> -> vector<8x128xf32>
    %23 = vector.broadcast %13 : vector<1x128xf32> to vector<8x128xf32>
    %24 = arith.addf %22, %23 : vector<8x128xf32>
    %25 = vector.broadcast %11 : vector<1x128xf32> to vector<8x128xf32>
    %26 = arith.mulf %24, %25 : vector<8x128xf32>
    %27 = math.tanh %26 : vector<8x128xf32>
    %cst_16 = arith.constant 5.000000e-01 : f32
    %28 = vector.broadcast %cst_16 : f32 to vector<8x128xf32>
    %29 = arith.mulf %28, %27 : vector<8x128xf32>
    %cst_17 = arith.constant 5.000000e-01 : f32
    %30 = vector.broadcast %cst_17 : f32 to vector<8x128xf32>
    %31 = arith.addf %29, %30 : vector<8x128xf32>
    %32 = vector.shape_cast %8 : vector<1x128xi1> to vector<1x128xi1>
    %33 = vector.broadcast %32 : vector<1x128xi1> to vector<8x128xi1>
    %34 = arith.select %33, %27, %31 : vector<8x128xi1>, vector<8x128xf32>
    %35 = vector.extract_strided_slice %34 {offsets = [0, 0], sizes = [8, 32], strides = [1, 1]} : vector<8x128xf32> to vector<8x32xf32>
    %36 = vector.extract_strided_slice %34 {offsets = [0, 32], sizes = [8, 32], strides = [1, 1]} : vector<8x128xf32> to vector<8x32xf32>
    %37 = vector.extract_strided_slice %34 {offsets = [0, 64], sizes = [8, 32], strides = [1, 1]} : vector<8x128xf32> to vector<8x32xf32>
    %38 = vector.extract_strided_slice %34 {offsets = [0, 96], sizes = [8, 32], strides = [1, 1]} : vector<8x128xf32> to vector<8x32xf32>
    %39 = arith.mulf %36, %17 : vector<8x32xf32>
    %40 = arith.mulf %35, %37 : vector<8x32xf32>
    %41 = arith.addf %39, %40 : vector<8x32xf32>
    %42 = math.tanh %41 : vector<8x32xf32>
    %43 = arith.mulf %38, %42 : vector<8x32xf32>
    %c0_18 = arith.constant 0 : index
    %c0_19 = arith.constant 0 : index
    %c0_20 = arith.constant 0 : index
    %44 = vector.load %arg6[%c0_18, %c0_19, %c0_20] : memref<2x32x32xf32, #tpu.memory_space<vmem>>, vector<1x32x32xf32>
    %45 = vector.shape_cast %44 : vector<1x32x32xf32> to vector<32x32xf32>
    %cst_21 = arith.constant dense<0.000000e+00> : vector<8x32xf32>
    %46 = tpu.matmul %43, %45, %cst_21 {dimension_numbers = #tpu.dot_dimension_numbers<[1], [0], [0], [1], [0, 0, 1, 1], [], []>} : vector<8x32xf32>, vector<32x32xf32>, vector<8x32xf32> -> vector<8x32xf32>
    %c0_22 = arith.constant 0 : index
    %c0_23 = arith.constant 0 : index
    %c0_24 = arith.constant 0 : index
    %47 = vector.load %arg7[%c0_22, %c0_23, %c0_24] : memref<2x1x32xf32, #tpu.memory_space<vmem>>, vector<1x1x32xf32>
    %48 = vector.shape_cast %47 : vector<1x1x32xf32> to vector<1x32xf32>
    %49 = vector.broadcast %48 : vector<1x32xf32> to vector<8x32xf32>
    %50 = arith.addf %46, %49 : vector<8x32xf32>
    %51 = math.tanh %50 : vector<8x32xf32>
    %c1 = arith.constant 1 : index
    %c0_25 = arith.constant 0 : index
    %c0_26 = arith.constant 0 : index
    %52 = vector.load %arg6[%c1, %c0_25, %c0_26] : memref<2x32x32xf32, #tpu.memory_space<vmem>>, vector<1x32x32xf32>
    %53 = vector.shape_cast %52 : vector<1x32x32xf32> to vector<32x32xf32>
    %cst_27 = arith.constant dense<0.000000e+00> : vector<8x32xf32>
    %54 = tpu.matmul %51, %53, %cst_27 {dimension_numbers = #tpu.dot_dimension_numbers<[1], [0], [0], [1], [0, 0, 1, 1], [], []>} : vector<8x32xf32>, vector<32x32xf32>, vector<8x32xf32> -> vector<8x32xf32>
    %c1_28 = arith.constant 1 : index
    %c0_29 = arith.constant 0 : index
    %c0_30 = arith.constant 0 : index
    %55 = vector.load %arg7[%c1_28, %c0_29, %c0_30] : memref<2x1x32xf32, #tpu.memory_space<vmem>>, vector<1x1x32xf32>
    %56 = vector.shape_cast %55 : vector<1x1x32xf32> to vector<1x32xf32>
    %57 = vector.broadcast %56 : vector<1x32xf32> to vector<8x32xf32>
    %58 = arith.addf %54, %57 : vector<8x32xf32>
    %59 = math.tanh %58 : vector<8x32xf32>
    %60 = vector.broadcast %14 : vector<1x32xf32> to vector<8x32xf32>
    %61 = arith.mulf %59, %60 : vector<8x32xf32>
    %cst_31 = arith.constant dense<0.000000e+00> : vector<8xf32>
    %62 = vector.multi_reduction <add>, %61, %cst_31 [1] : vector<8x32xf32> to vector<8xf32>
    %63 = vector.broadcast %15 : f32 to vector<8xf32>
    %64 = arith.addf %62, %63 : vector<8xf32>
    %65 = arith.index_cast %c0_i32_12 : i32 to index
    %c0_32 = arith.constant 0 : index
    %66 = vector.load %arg10[%65, %c0_32] : memref<1x8xf32, #tpu.memory_space<vmem>>, vector<1x8xf32>
    %67 = vector.shape_cast %66 : vector<1x8xf32> to vector<8xf32>
    %68 = vector.shape_cast %64 : vector<8xf32> to vector<1x8xf32>
    tpu.vector_store %arg10[%65, %c0_32], %68 {strides = array<i32>} : memref<1x8xf32, #tpu.memory_space<vmem>>, vector<1x8xf32>,
    %c1_i32 = arith.constant 1 : i32
    %c0_33 = arith.constant 0 : index
    %c0_34 = arith.constant 0 : index
    %69 = vector.load %arg11[%c0_33, %c0_34] : memref<8x32xf32, #tpu.memory_space<vmem>>, vector<8x32xf32>
    tpu.vector_store %arg11[%c0_33, %c0_34], %43 {strides = array<i32>} : memref<8x32xf32, #tpu.memory_space<vmem>>, vector<8x32xf32>,
    %c0_35 = arith.constant 0 : index
    %c0_36 = arith.constant 0 : index
    %70 = vector.load %arg12[%c0_35, %c0_36] : memref<8x32xf32, #tpu.memory_space<vmem>>, vector<8x32xf32>
    tpu.vector_store %arg12[%c0_35, %c0_36], %41 {strides = array<i32>} : memref<8x32xf32, #tpu.memory_space<vmem>>, vector<8x32xf32>,
    return
  }
  func.func @transform_0(%arg0: i32) -> (i32, i32, i32) {
    %c0_i32 = arith.constant 0 : i32
    %c0_i32_0 = arith.constant 0 : i32
    %c0_i32_1 = arith.constant 0 : i32
    return %arg0, %c0_i32, %c0_i32_0 : i32, i32, i32
  }
  func.func @transform_1(%arg0: i32) -> (i32, i32) {
    %c0_i32 = arith.constant 0 : i32
    %c0_i32_0 = arith.constant 0 : i32
    %c0_i32_1 = arith.constant 0 : i32
    return %c0_i32, %c0_i32_0 : i32, i32
  }
  func.func @transform_2(%arg0: i32) -> (i32, i32) {
    %c0_i32 = arith.constant 0 : i32
    %c0_i32_0 = arith.constant 0 : i32
    %c0_i32_1 = arith.constant 0 : i32
    return %c0_i32, %c0_i32_0 : i32, i32
  }
  func.func @transform_3(%arg0: i32) -> (i32, i32) {
    %c0_i32 = arith.constant 0 : i32
    %c0_i32_0 = arith.constant 0 : i32
    %c0_i32_1 = arith.constant 0 : i32
    return %c0_i32, %c0_i32_0 : i32, i32
  }
  func.func @transform_4(%arg0: i32) -> (i32, i32) {
    %c0_i32 = arith.constant 0 : i32
    %c0_i32_0 = arith.constant 0 : i32
    %c0_i32_1 = arith.constant 0 : i32
    return %c0_i32, %c0_i32_0 : i32, i32
  }
  func.func @transform_5(%arg0: i32) -> (i32, i32, i32) {
    %c0_i32 = arith.constant 0 : i32
    %c0_i32_0 = arith.constant 0 : i32
    %c0_i32_1 = arith.constant 0 : i32
    %c0_i32_2 = arith.constant 0 : i32
    return %c0_i32, %c0_i32_0, %c0_i32_1 : i32, i32, i32
  }
  func.func @transform_6(%arg0: i32) -> (i32, i32, i32) {
    %c0_i32 = arith.constant 0 : i32
    %c0_i32_0 = arith.constant 0 : i32
    %c0_i32_1 = arith.constant 0 : i32
    %c0_i32_2 = arith.constant 0 : i32
    return %c0_i32, %c0_i32_0, %c0_i32_1 : i32, i32, i32
  }
  func.func @transform_7(%arg0: i32) -> (i32, i32) {
    %c0_i32 = arith.constant 0 : i32
    %c0_i32_0 = arith.constant 0 : i32
    %c0_i32_1 = arith.constant 0 : i32
    return %c0_i32, %c0_i32_0 : i32, i32
  }
  func.func @transform_8(%arg0: i32) -> i32 {
    %c0_i32 = arith.constant 0 : i32
    %c0_i32_0 = arith.constant 0 : i32
    return %c0_i32 : i32
  }
  func.func @transform_9(%arg0: i32) -> (i32, i32) {
    %c0_i32 = arith.constant 0 : i32
    %c0_i32_0 = arith.constant 0 : i32
    return %arg0, %c0_i32 : i32, i32
  }
  func.func @transform_10(%arg0: i32) -> (i32, i32) {
    %c0_i32 = arith.constant 0 : i32
    %c0_i32_0 = arith.constant 0 : i32
    %c0_i32_1 = arith.constant 0 : i32
    return %c0_i32, %c0_i32_0 : i32, i32
  }
  func.func @transform_11(%arg0: i32) -> (i32, i32) {
    %c0_i32 = arith.constant 0 : i32
    %c0_i32_0 = arith.constant 0 : i32
    %c0_i32_1 = arith.constant 0 : i32
    return %c0_i32, %c0_i32_0 : i32, i32
  }
}

</mosaic_0001>

<bundles_post_ra>
// kernel: critic_forward_sequence.1
= control target key start
LH: loop header
LB: loop body
LE: loop exit
PB: predicated region body
PF: predicated region fallthrough
CT: control target
= control target key end

     0   :  { %vm41_vm0 = vcmask 261120   ;;  %s251_s13 = smov 16   ;;  %s252_s22 = smov 32   ;;  %vm67_vm1 = vcmask 130048   ;;  %vm72_vm2 = vcmask 392192   ;;  %v45_v13 = vlaneseq  ;;  %s418_s1 = inlined_call_operand.vmem [shape: f32[8,32], index: 1, kind: input, shape index: {}, may-alias: {1,10}]   ;;  %s419_s10 = inlined_call_operand.vmem [shape: f32[8,32], index: 10, kind: output, shape index: {1}, may-alias: {1,10}]   ;;  %s420_s3 = inlined_call_operand.vmem [shape: f32[48,128], index: 3, kind: input, shape index: {}]   ;;  %s421_s4 = inlined_call_operand.vmem [shape: f32[1,128], index: 4, kind: input, shape index: {}]   ;;  %s422_s2 = inlined_call_operand.vmem [shape: f32[8,32], index: 2, kind: input, shape index: {}, may-alias: {2,11}]   ;;  %s423_s11 = inlined_call_operand.vmem [shape: f32[8,32], index: 11, kind: output, shape index: {2}, may-alias: {2,11}]   ;;  %s424_s0 = inlined_call_operand.vmem [shape: f32[1,8,16], index: 0, kind: input, shape index: {}]   ;;  %s425_s6 = inlined_call_operand.vmem [shape: f32[2,1,32], index: 6, kind: input, shape index: {}]   ;;  %s426_s5 = inlined_call_operand.vmem [shape: f32[2,32,32], index: 5, kind: input, shape index: {}]   ;;  %s427_s7 = inlined_call_operand.vmem [shape: f32[1,32], index: 7, kind: input, shape index: {}]   ;;  %s428_s8 = inlined_call_operand.<no memory space> [shape: f32[1], index: 8, kind: input, shape index: {}]   ;;  %s429_s9 = inlined_call_operand.vmem [shape: f32[1,8], index: 9, kind: output, shape index: {0}]  }
   0x1   :  { %v40_v0 = vld [vmem:[%s418_s1] sm:$0xff]  ;;  %v56_v1 = vld [vmem:[%s420_s3 + $0x28] sm:$0xff]  ;;  %v54_v3 = vld [vmem:[%s420_s3 + $0x18] sm:$0xff]  ;;  %v253_v16 = vmov 0.5   ;;  %v200_v55 = vstv %s428_s8  ;;  %vm205_vm6 = vcmask 57344  }
   0x2   :  { %v55_v2 = vld [vmem:[%s420_s3 + $0x20] sm:$0xff]  ;;  %42 = vst.msk [vmem:[%s419_s10] sm:$0xff] %vm41_vm0, %v40_v0  ;;  %86 = vmatpush.msra.mxu0 %v56_v1  ;;  %v53_v4 = vld [vmem:[%s420_s3 + $0x10] sm:$0xff]  ;;  %v52_v5 = vld [vmem:[%s420_s3 + $0x8] sm:$0xff]  ;;  %v358_v14 = vand.u32 127, %v45_v13 }
   0x3   :  { %v51_v7 = vld [vmem:[%s420_s3] sm:$0xff]  ;;  %v127_v32 = vld [vmem:[%s426_s5 + $0x18] sm:$0xff]  ;;  %v126_v33 = vld [vmem:[%s426_s5 + $0x10] sm:$0xff] }
   0x4   :  { %87 = vmatpush.msra.mxu0 %v55_v2  ;;  %v43_v8 = vld [vmem:[%s422_s2] sm:$0xff]  ;;  %vm47_vm3 = vcmp.ge.s32.totalorder %v358_v14, 64  ;;  %vm48_vm4 = vcmp.lt.s32.totalorder %v358_v14, 96  ;;  %150 = vmatpush.msra.mxu1 %v127_v32  ;;  %v125_v34 = vld [vmem:[%s426_s5 + $0x8] sm:$0xff]  ;;  %v231_v40 = vld [vmem:[%s426_s5 + $0x38] sm:$0xff] }
   0x5   :  { %44 = vst.msk [vmem:[%s423_s11] sm:$0xff] %vm41_vm0, %v43_v8  ;;  %v62_v10 = vld [vmem:[%s424_s0] sm:$0xff]  ;;  %vm49_vm5 = vmand %vm47_vm3, %vm48_vm4  ;;  %s254_s0 = smov 64   ;;  %184 = vmatpush.msra.mxu2 %v231_v40  ;;  %v230_v41 = vld [vmem:[%s426_s5 + $0x30] sm:$0xff] }
   0x6   :  { %88 = vmatpush.msra.mxu0 %v54_v3  ;;  %v239_v15 = vld [vmem:[%s421_s4] ss:$0 sm:$0xff]  ;;  %v50_v17 = vsel %vm49_vm5, 1.0, %v253_v16  ;;  %s255_s4 = smov 96   ;;  %151 = vmatpush.msra.mxu1 %v126_v33  ;;  %v229_v42 = vld [vmem:[%s426_s5 + $0x28] sm:$0xff] }
   0x7   :  { %v124_v35 = vld [vmem:[%s426_s5] sm:$0xff]  ;;  %185 = vmatpush.msra.mxu2 %v230_v41 }
   0x8   :  { %89 = vmatpush.msra.mxu0 %v53_v4  ;;  %152 = vmatpush.msra.mxu1 %v125_v34  ;;  %v228_v43 = vld [vmem:[%s426_s5 + $0x20] sm:$0xff] }
   0x9   :  { %v60_v6 = vld [vmem:[%s419_s10] sm:$0xff]  ;;  %186 = vmatpush.msra.mxu2 %v229_v42 }
   0xa   :  { %64 = vrot.lane.b32.xlu0 %v60_v6, %s251_s13  ;;  %90 = vmatpush.msra.mxu0 %v52_v5  ;;  %v240_v44 = vld [vmem:[%s425_s6] ss:$0 sm:$0xff]  ;;  %v241_v48 = vld [vmem:[%s425_s6 + $0x1] ss:$0 sm:$0xff] }
   0xb   :  { %153 = vmatpush.msra.mxu1 %v124_v35  ;;  %187 = vmatpush.msra.mxu2 %v228_v43  ;;  %v242_v51 = vld [vmem:[%s427_s7] ss:$0 sm:$0xff] }
   0xc   :  { %91 = vmatpush.msra.mxu0 %v51_v7  ;;  %v61_v9 = vld [vmem:[%s423_s11] sm:$0xff] }
   0xd   :  { %104 = vrot.lane.b32.xlu1 %v61_v9, %s252_s22 }
  0x7c   :  { %v65_v11 = vpop.permute.xlu0 %64 }
  0x7d   :  { %v68_v12 = vsel %vm67_vm1, %v62_v10, %v65_v11 }
  0x7e   :  { %226 = vmatmul.msk.f32.vlgmr.msra.gmra.mxu0 %vm72_vm2, %v68_v12 }
  0x7f   :  { %v105_v27 = vpop.permute.xlu1 %104 }
  0xfb   :  { %v93_v18 = vpop.f32.mrf.mxu0 }
  0xfc   :  { %v94_v19 = vadd.f32 %v239_v15, %v93_v18 }
  0xfe   :  { %v96_v20 = vmul.f32 %v94_v19, %v50_v17 }
 0x100   :  { %243 = vtanh.f32 %v96_v20 }
 0x106   :  { %v244_v21 = vpop.eup %243 }
 0x107   :  { %v98_v22 = vmul.f32 0.5, %v244_v21 }
 0x109   :  { %v99_v23 = vadd.f32 0.5, %v98_v22 }
 0x10b   :  { %v102_v24 = vsel %vm49_vm5, %v244_v21, %v99_v23 }
 0x10c   :  { %109 = vrot.lane.b32.xlu0 %v102_v24, %s254_s0  ;;  %v107_v28 = vmul.f32 %v105_v27, %v102_v24 }
 0x17e   :  { %v110_v25 = vpop.permute.xlu0 %109 }
 0x17f   :  { %v112_v26 = vmul.f32 %v110_v25, %v102_v24 }
 0x181   :  { %114 = vrot.lane.b32.xlu1 %v112_v26, %s252_s22 }
 0x1f3   :  { %v115_v29 = vpop.permute.xlu1 %114 }
 0x1f4   :  { %v117_v30 = vadd.f32 %v115_v29, %v107_v28 }
 0x1f6   :  { %245 = vtanh.f32 %v117_v30  ;;  %210 = vrot.lane.b32.xlu1 %v117_v30, %s255_s4 }
 0x1fc   :  { %v246_v31 = vpop.eup %245 }
 0x1fd   :  { %120 = vrot.lane.b32.xlu2 %v246_v31, %s254_s0 }
 0x257   :  { %v121_v36 = vpop.permute.xlu2 %120 }
 0x258   :  { %v123_v37 = vmul.f32 %v121_v36, %v102_v24 }
 0x25a   :  { %133 = vrot.lane.b32.xlu2 %v123_v37, %s252_s22 }
 0x268   :  { %v211_v38 = vpop.permute.xlu1 %210 }
 0x269   :  { %213 = vst.msk [vmem:[%s423_s11] sm:$0xff] %vm41_vm0, %v211_v38 }
 0x2b4   :  { %v134_v39 = vpop.permute.xlu2 %133 }
 0x2b5   :  { %208 = vst.msk [vmem:[%s419_s10] sm:$0xff] %vm41_vm0, %v134_v39  ;;  %227 = vmatmul.msk.f32.vlgmr.msra.gmra.mxu1 %vm41_vm0, %v134_v39 }
 0x332   :  { %v155_v45 = vpop.f32.mrf.mxu1 }
 0x333   :  { %v156_v46 = vadd.f32 %v240_v44, %v155_v45 }
 0x335   :  { %247 = vtanh.f32 %v156_v46 }
 0x33b   :  { %v248_v47 = vpop.eup %247 }
 0x33c   :  { %233 = vmatmul.msk.f32.vlgmr.msra.gmra.mxu2 %vm41_vm0, %v248_v47 }
 0x3bf   :  { %v189_v49 = vpop.f32.mrf.mxu2 }
 0x3c0   :  { %v190_v50 = vadd.f32 %v241_v48, %v189_v49 }
 0x3c2   :  { %249 = vtanh.f32 %v190_v50 }
 0x3c8   :  { %v250_v52 = vpop.eup %249 }
 0x3c9   :  { %v196_v53 = vmul.f32 %v250_v52, %v242_v51 }
 0x3cb   :  { %v197_v54 = vsel %vm41_vm0, %v196_v53, 0.0 }
 0x3cc   :  { %198 = vadd.xlane.f32.xlu0 %v197_v54 }
 0x43f   :  { %v199_v56 = vpop.xlane.xlu0 %198 }
 0x440   :  { %v201_v57 = vadd.f32 %v200_v55, %v199_v56 }
 0x442   :  { %v203_v58 = vperm.slane %v201_v57, %v358_v14 }
 0x444   :  { %206 = vst.msk [vmem:[%s429_s9] sm:$0x1] %vm205_vm6, %v203_v58 }

</bundles_post_ra>
